<compile_context>
chip_gen: v7x
topology: tpu7x:2x2x1
jax: 0.10.0
libtpu: 0.0.40
codegen_flags: <defaults>
</compile_context>

<pallas_src>
import functools

import jax
import jax.numpy as jnp
from jax.experimental import pallas as pl
from jax.experimental.pallas import tpu as pltpu


def _round_up(x: int, m: int) -> int:
    return -(-x // m) * m


def _vmem_budget():
    """Generation-aware (tile budget, scoped vmem limit) in bytes."""
    try:
        cap = int(pltpu.get_tpu_info().vmem_capacity_bytes)
    except Exception:  # pragma: no cover - be conservative if the query fails
        cap = 64 * 1024 * 1024
    if cap >= 128 * 1024 * 1024:          # v5e / v6e: 128 MiB physical VMEM
        return 40 * 1024 * 1024, 64 * 1024 * 1024
    # v7x-class: 64 MiB physical / 32 MiB scoped -> stay well under.
    return 20 * 1024 * 1024, 32 * 1024 * 1024


def _pick_pixel_tile(hw, n_batch, cin, cout, x_bytes, out_bytes, budget,
                     target=8192):
    """Largest multiple-of-128 pixel tile whose double-buffered in+out blocks
    fit the generation-aware VMEM budget; guarantees >=2 grid steps when the
    image allows it (so both v7x TensorCores get work)."""
    per_col = 2 * (cin * x_bytes + cout * out_bytes)   # 2 = double buffering
    cap = max(128, (budget // max(per_col, 1)) // 128 * 128)
    t = int(min(target, cap, _round_up(hw, 128)))
    if n_batch * (-(-hw // t)) < 2 and t > 128:
        t = max(128, _round_up(-(-hw // 2), 128))
    return t


def _conv_fma_kernel(x_ref, w_ref, shift_ref, o_ref):
    """Tiny-channel path (Cout < 8): single full (Cout, T) accumulator built
    from broadcast FMAs (w column broadcast over lanes, x row over sublanes).

    x_ref:     (Cin, T)   native dtype (cast to f32 in-register)
    w_ref:     (Cout, Cin) f32 VMEM (BN scale folded in)
    shift_ref: (Cout, 1)  f32 VMEM (folded BN shift)
    o_ref:     (Cout, T)  final dtype, lane-dense stores
    """
    cout, cin = w_ref.shape
    t = x_ref.shape[-1]
    x = x_ref[...].astype(jnp.float32)
    w = w_ref[...]
    acc = jnp.broadcast_to(shift_ref[...], (cout, t))
    for c in range(cin):                               # static, small Cin
        acc = acc + w[:, c:c + 1] * x[c:c + 1, :]
    o_ref[...] = jnp.maximum(acc, 0.0).astype(o_ref.dtype)


def _conv_mxu_kernel(x_ref, w_ref, shift_ref, o_ref):
    """Main path: bf16 x bf16 -> f32 MXU matmul + shift + ReLU.

    x_ref: (Cin, T) native dtype (cast to bf16 in-register),
    w_ref: (Cout, Cin) bf16, shift_ref: (Cout, 1) f32.
    """
    x = x_ref[...].astype(jnp.bfloat16)
    y = jnp.dot(w_ref[...], x, preferred_element_type=jnp.float32)
    o_ref[...] = jnp.maximum(y + shift_ref[...], 0.0).astype(o_ref.dtype)


def conv1x1_bn_relu(x, w_folded, shift, out_dtype):
    """Fused 1x1 conv + BN + ReLU:  relu(w_folded @ x + shift).

    x:        [N, Cin, HW]  (native dtype; cast happens inside the kernel)
    w_folded: [Cout, Cin]   f32, BN scale already folded in
    shift:    [Cout]        f32, folded BN shift
    returns:  [N, Cout, HW] in out_dtype (f32 accumulation inside).
    """
    N, Cin, HW = x.shape
    Cout = w_folded.shape[0]
    out_dtype = jnp.dtype(out_dtype)

    budget, vmem_limit = _vmem_budget()
    t = _pick_pixel_tile(HW, N, Cin, Cout, x.dtype.itemsize,
                         out_dtype.itemsize, budget)
    grid = (N, -(-HW // t))   # ragged last block: masked store discards OOB lanes

    # MXU whenever Cout >= 8: the kernel is HBM-bound, so an under-filled MXU
    # is free, while the VPU path would be VALU-bound.  Both layouts store a
    # lane-dense (Cout, T) block either way.
    use_fma = (Cout < 8) and (Cin <= 16)
    kernel = _conv_fma_kernel if use_fma else _conv_mxu_kernel
    w_dtype = jnp.float32 if use_fma else jnp.bfloat16

    return pl.pallas_call(
        kernel,
        out_shape=jax.ShapeDtypeStruct((N, Cout, HW), out_dtype),
        grid_spec=pltpu.PrefetchScalarGridSpec(
            num_scalar_prefetch=0,
            grid=grid,
            in_specs=[
                pl.BlockSpec((None, Cin, t), lambda n, p: (n, 0, p)),
                pl.BlockSpec((Cout, Cin), lambda n, p: (0, 0)),
                pl.BlockSpec((Cout, 1), lambda n, p: (0, 0)),
            ],
            out_specs=pl.BlockSpec((None, Cout, t), lambda n, p: (n, 0, p)),
        ),
        compiler_params=pltpu.CompilerParams(
            dimension_semantics=("parallel", "parallel"),   # shards across v7x TCs
            vmem_limit_bytes=vmem_limit,
        ),
    )(x, w_folded.astype(w_dtype), shift.reshape(Cout, 1).astype(jnp.float32))


@functools.partial(jax.jit, static_argnames=("scale_factor", "eps"))
def upsample_cat(low, high, conv_weight, bn_gamma, bn_beta, bn_mean, bn_var,
                 scale_factor=2, eps=1e-5):
    """low: [N, Cin, H, W] NCHW,  high: [N, Chigh, s*H, s*W]
       conv_weight: [Cout, Cin, 1, 1]  (bias=False, matching ConvNormAct)
       returns [N, Cout + Chigh, s*H, s*W] (BatchNorm in inference mode)."""
    N, Cin, H, W = low.shape
    Cout = conv_weight.shape[0]
    s = scale_factor

    # Fold 1x1 conv weight + BatchNorm into a single scaled matmul + shift.
    w2d = conv_weight[:, :, 0, 0].astype(jnp.float32)                  # [Cout, Cin]
    bn_scale = bn_gamma.astype(jnp.float32) / jnp.sqrt(bn_var.astype(jnp.float32) + eps)
    bn_shift = bn_beta.astype(jnp.float32) - bn_mean.astype(jnp.float32) * bn_scale
    w_folded = w2d * bn_scale[:, None]

    # conv+BN+ReLU at the ORIGINAL resolution (commutes with nearest upsample).
    # `low` is passed in its native dtype; the kernel casts in-register, so no
    # wrapper-side convert / extra HBM round-trip.
    x = low.reshape(N, Cin, H * W)
    y = conv1x1_bn_relu(x, w_folded, bn_shift, high.dtype).reshape(N, Cout, H, W)

    # Nearest upsample = pure pixel replication (broadcast), then channel concat.
    # TODO(synk): fuse the replication into the kernel's store (write row tiles
    # directly into the [N, Cout, H*s, W*s] buffer) to drop this staging copy.
    y_up = jnp.broadcast_to(y[:, :, :, None, :, None], (N, Cout, H, s, W, s))
    y_up = y_up.reshape(N, Cout, H * s, W * s)
    return jnp.concatenate([y_up, high], axis=1)


def _reference_torch_order(low, high, w2d, gamma, beta, mean, var, s, eps):
    """Plain-JAX reference in the PyTorch order: upsample -> conv -> BN -> ReLU -> cat."""
    up = jnp.repeat(jnp.repeat(low, s, axis=2), s, axis=3)
    conv = jnp.einsum("nchw,oc->nohw", up, w2d)
    scale = gamma / jnp.sqrt(var + eps)
    bn = (conv - mean[None, :, None, None]) * scale[None, :, None, None] \
        + beta[None, :, None, None]
    return jnp.concatenate([jnp.maximum(bn, 0.0), high], axis=1)


if __name__ == "__main__":
    s = 2

    # ---------------- test 1: tiny channels (VPU broadcast-FMA path) ----------------
    N, Cin, Cout, H, W = 2, 4, 4, 16, 16
    k1, k2, k3, k4, k5, k6, k7 = jax.random.split(jax.random.PRNGKey(0), 7)
    low = jax.random.normal(k1, (N, Cin, H, W), jnp.float32)
    high = jax.random.normal(k2, (N, Cout, H * s, W * s), jnp.float32)
    conv_weight = jax.random.normal(k3, (Cout, Cin, 1, 1), jnp.float32) * 0.2
    bn_gamma = 1.0 + 0.1 * jax.random.normal(k4, (Cout,), jnp.float32)
    bn_beta = 0.1 * jax.random.normal(k5, (Cout,), jnp.float32)
    bn_mean = 0.1 * jax.random.normal(k6, (Cout,), jnp.float32)
    bn_var = 1.0 + 0.1 * jax.random.uniform(k7, (Cout,), jnp.float32)

    out = jax.block_until_ready(
        upsample_cat(low, high, conv_weight, bn_gamma, bn_beta, bn_mean, bn_var,
                     scale_factor=s))
    assert out.shape == (N, 2 * Cout, H * s, W * s), out.shape

    # FMA path keeps activations in f32 -> compare against the exact reference.
    ref = _reference_torch_order(low, high, conv_weight[:, :, 0, 0],
                                 bn_gamma, bn_beta, bn_mean, bn_var, s, 1e-5)
    err = float(jnp.max(jnp.abs(out - ref)))
    assert jnp.allclose(out, ref, atol=1e-4, rtol=1e-4), err

    # -------- test 2: large channels (MXU path) + ragged pixel tile (HW=144) --------
    N2, C2, H2, W2 = 1, 128, 12, 12
    j1, j2, j3 = jax.random.split(jax.random.PRNGKey(1), 3)
    low2 = jax.random.normal(j1, (N2, C2, H2, W2), jnp.float32)
    high2 = jax.random.normal(j2, (N2, C2, H2 * s, W2 * s), jnp.float32)
    w2 = jax.random.normal(j3, (C2, C2, 1, 1), jnp.float32) * 0.05
    g2 = jnp.ones((C2,), jnp.float32)
    b2 = jnp.zeros((C2,), jnp.float32)
    m2 = jnp.zeros((C2,), jnp.float32)
    v2 = jnp.ones((C2,), jnp.float32)

    out2 = jax.block_until_ready(
        upsample_cat(low2, high2, w2, g2, b2, m2, v2, scale_factor=s))
    assert out2.shape == (N2, 2 * C2, H2 * s, W2 * s), out2.shape

    # MXU path quantizes activations + folded weights to bf16 (f32 accumulation).
    low2_q = low2.astype(jnp.bfloat16).astype(jnp.float32)
    ref2 = _reference_torch_order(low2_q, high2, w2[:, :, 0, 0], g2, b2, m2, v2, s, 1e-5)
    err2 = float(jnp.max(jnp.abs(out2 - ref2)))
    assert jnp.allclose(out2, ref2, atol=3e-2, rtol=3e-2), err2

    print("KERNEL_OK")
</pallas_src>

<mosaic_0001>
module attributes {stable_mosaic.version = 11 : i64} {
  func.func @_conv_fma_kernel(%arg0: i32, %arg1: i32, %arg2: memref<1x4x256xf32, #tpu.memory_space<vmem>>, %arg3: memref<4x4xf32, #tpu.memory_space<vmem>>, %arg4: memref<4x1xf32, #tpu.memory_space<vmem>>, %arg5: memref<1x4x256xf32, #tpu.memory_space<vmem>>) attributes {dimension_semantics = [#tpu.dimension_semantics<parallel>, #tpu.dimension_semantics<parallel>], iteration_bounds = array<i64: 2, 1>, scalar_prefetch = 0 : i64, scratch_operands = 0 : i64, tpu.core_type = #tpu.core_type<tc>, window_params = [{transform_indices = @transform_0, window_bounds = array<i64: 1, 4, 256>}, {pipeline_mode = #tpu.pipeline_mode<synchronous>, transform_indices = @transform_1, window_bounds = array<i64: 4, 4>}, {pipeline_mode = #tpu.pipeline_mode<synchronous>, transform_indices = @transform_2, window_bounds = array<i64: 4, 1>}, {transform_indices = @transform_3, window_bounds = array<i64: 1, 4, 256>}]} {
    %c0 = arith.constant 0 : index
    %c0_0 = arith.constant 0 : index
    %c0_1 = arith.constant 0 : index
    %0 = vector.load %arg2[%c0, %c0_0, %c0_1] : memref<1x4x256xf32, #tpu.memory_space<vmem>>, vector<1x4x256xf32>
    %1 = vector.shape_cast %0 : vector<1x4x256xf32> to vector<4x256xf32>
    %c0_2 = arith.constant 0 : index
    %c0_3 = arith.constant 0 : index
    %2 = vector.load %arg3[%c0_2, %c0_3] : memref<4x4xf32, #tpu.memory_space<vmem>>, vector<4x4xf32>
    %c0_4 = arith.constant 0 : index
    %c0_5 = arith.constant 0 : index
    %3 = vector.load %arg4[%c0_4, %c0_5] : memref<4x1xf32, #tpu.memory_space<vmem>>, vector<4x1xf32>
    %4 = vector.shape_cast %3 : vector<4x1xf32> to vector<4x1xf32>
    %5 = vector.broadcast %4 : vector<4x1xf32> to vector<4x256xf32>
    %6 = vector.extract_strided_slice %2 {offsets = [0, 0], sizes = [4, 1], strides = [1, 1]} : vector<4x4xf32> to vector<4x1xf32>
    %7 = vector.extract_strided_slice %1 {offsets = [0, 0], sizes = [1, 256], strides = [1, 1]} : vector<4x256xf32> to vector<1x256xf32>
    %8 = vector.broadcast %6 : vector<4x1xf32> to vector<4x256xf32>
    %9 = vector.broadcast %7 : vector<1x256xf32> to vector<4x256xf32>
    %10 = arith.mulf %8, %9 : vector<4x256xf32>
    %11 = arith.addf %5, %10 : vector<4x256xf32>
    %12 = vector.extract_strided_slice %2 {offsets = [0, 1], sizes = [4, 1], strides = [1, 1]} : vector<4x4xf32> to vector<4x1xf32>
    %13 = vector.extract_strided_slice %1 {offsets = [1, 0], sizes = [1, 256], strides = [1, 1]} : vector<4x256xf32> to vector<1x256xf32>
    %14 = vector.broadcast %12 : vector<4x1xf32> to vector<4x256xf32>
    %15 = vector.broadcast %13 : vector<1x256xf32> to vector<4x256xf32>
    %16 = arith.mulf %14, %15 : vector<4x256xf32>
    %17 = arith.addf %11, %16 : vector<4x256xf32>
    %18 = vector.extract_strided_slice %2 {offsets = [0, 2], sizes = [4, 1], strides = [1, 1]} : vector<4x4xf32> to vector<4x1xf32>
    %19 = vector.extract_strided_slice %1 {offsets = [2, 0], sizes = [1, 256], strides = [1, 1]} : vector<4x256xf32> to vector<1x256xf32>
    %20 = vector.broadcast %18 : vector<4x1xf32> to vector<4x256xf32>
    %21 = vector.broadcast %19 : vector<1x256xf32> to vector<4x256xf32>
    %22 = arith.mulf %20, %21 : vector<4x256xf32>
    %23 = arith.addf %17, %22 : vector<4x256xf32>
    %24 = vector.extract_strided_slice %2 {offsets = [0, 3], sizes = [4, 1], strides = [1, 1]} : vector<4x4xf32> to vector<4x1xf32>
    %25 = vector.extract_strided_slice %1 {offsets = [3, 0], sizes = [1, 256], strides = [1, 1]} : vector<4x256xf32> to vector<1x256xf32>
    %26 = vector.broadcast %24 : vector<4x1xf32> to vector<4x256xf32>
    %27 = vector.broadcast %25 : vector<1x256xf32> to vector<4x256xf32>
    %28 = arith.mulf %26, %27 : vector<4x256xf32>
    %29 = arith.addf %23, %28 : vector<4x256xf32>
    %cst = arith.constant 0.000000e+00 : f32
    %30 = vector.broadcast %cst : f32 to vector<4x256xf32>
    %31 = arith.maximumf %29, %30 : vector<4x256xf32>
    %c0_6 = arith.constant 0 : index
    %c0_7 = arith.constant 0 : index
    %c0_8 = arith.constant 0 : index
    %32 = vector.load %arg5[%c0_6, %c0_7, %c0_8] : memref<1x4x256xf32, #tpu.memory_space<vmem>>, vector<1x4x256xf32>
    %33 = vector.shape_cast %32 : vector<1x4x256xf32> to vector<4x256xf32>
    %34 = vector.shape_cast %31 : vector<4x256xf32> to vector<1x4x256xf32>
    tpu.vector_store %arg5[%c0_6, %c0_7, %c0_8], %34 {strides = array<i32>} : memref<1x4x256xf32, #tpu.memory_space<vmem>>, vector<1x4x256xf32>,
    return
  }
  func.func @transform_0(%arg0: i32, %arg1: i32) -> (i32, i32, i32) {
    %c0_i32 = arith.constant 0 : i32
    %c0_i32_0 = arith.constant 0 : i32
    return %arg0, %c0_i32, %arg1 : i32, i32, i32
  }
  func.func @transform_1(%arg0: i32, %arg1: i32) -> (i32, i32) {
    %c0_i32 = arith.constant 0 : i32
    %c0_i32_0 = arith.constant 0 : i32
    %c0_i32_1 = arith.constant 0 : i32
    return %c0_i32, %c0_i32_0 : i32, i32
  }
  func.func @transform_2(%arg0: i32, %arg1: i32) -> (i32, i32) {
    %c0_i32 = arith.constant 0 : i32
    %c0_i32_0 = arith.constant 0 : i32
    %c0_i32_1 = arith.constant 0 : i32
    return %c0_i32, %c0_i32_0 : i32, i32
  }
  func.func @transform_3(%arg0: i32, %arg1: i32) -> (i32, i32, i32) {
    %c0_i32 = arith.constant 0 : i32
    %c0_i32_0 = arith.constant 0 : i32
    return %arg0, %c0_i32, %arg1 : i32, i32, i32
  }
}

</mosaic_0001>

<bundles_post_ra>
// kernel: upsample_cat.1
= control target key start
LH: loop header
LB: loop body
LE: loop exit
PB: predicated region body
PF: predicated region fallthrough
CT: control target
= control target key end

     0   :  { %s511_s12 = smov 0   ;;  %s513_s13 = smov 0   ;;  %s557_s0 = inlined_call_operand.vmem [shape: f32[2,4,256], index: 0, kind: input, shape index: {}]   ;;  %s558_s1 = inlined_call_operand.vmem [shape: f32[4,4], index: 1, kind: input, shape index: {}]   ;;  %s559_s2 = inlined_call_operand.vmem [shape: f32[4,1], index: 2, kind: input, shape index: {}]   ;;  %s560_s3 = inlined_call_operand.vmem [shape: f32[2,4,256], index: 3, kind: output, shape index: {}]  }
   0x1   :  { %s515_s14 = smov 0  }
   0x2 LB: > { %s25_s15 = sadd.s32 1, %s481_s13  ;;  %p422_p0 = scmp.ge.s32.totalorder %s485_s14, 1  ;;  %s485_s14 = sphi %s515_s14, %s13_s14   ;;  %s481_s13 = sphi %s513_s13, %s562_s13   ;;  %s477_s12 = sphi %s511_s12, %s561_s12  }
   0x3   : > { %p27_p1 = scmp.ge.s32.totalorder %s25_s15, 2  ;;  %p158_p2 = scmp.lt.s32.totalorder %s485_s14, 3 }
   0x5   : > { %s564_s15 = smov (%p27_p1, %s25_s15), 0  ;;  %p159_p3 = pnand %p422_p0, %p158_p2 }
   0x6   : > { %v211_v0 = vld [vmem:[%s558_s1] sm:$0xf] (!%p159_p3)  ;;  %v487_v1 = vmov (!%p159_p3), 0   ;;  %v488_v2 = vmov (!%p159_p3), 1   ;;  %v489_v4 = vmov (!%p159_p3), 2   ;;  %v490_v5 = vmov (!%p159_p3), 3  }
   0x7   : > { %162 = sbr.rel (%p159_p3) target bundleno = 154 (0x9a), region = 32  ;;  %459 = vset.pattern.permute.xlu0 (!%p159_p3), %v487_v1  ;;  %460 = vset.pattern.permute.xlu1 (!%p159_p3), %v488_v2  ;;  %v212_v3 = vld [vmem:[%s559_s2] sm:$0xf] (!%p159_p3)  ;;  %p191_p4 = scmp.lt.s32.totalorder (!%p159_p3), %s477_s12, 1  ;;  %v224_v6 = vlaneseq (!%p159_p3) }
   0x8   : > { %220 = vperm.xlu0 (!%p159_p3), %459, %v211_v0   ;;  %247 = vperm.xlu1 (!%p159_p3), %460, %v211_v0  }
   0x9   : > { %v225_v7 = vshrl.u32 (!%p159_p3), %v224_v6, 7 }
   0xb   : > { %v226_v8 = vsub.s32 (!%p159_p3), 0, %v225_v7  ;;  %v230_v9 = vsub.s32 (!%p159_p3), 4, %v225_v7  ;;  %v252_v11 = vsub.s32 (!%p159_p3), 1, %v225_v7  ;;  %v256_v12 = vsub.s32 (!%p159_p3), 5, %v225_v7 }
   0xc   : > { %215 = vperm.xlu0 (!%p159_p3), %459, %v212_v3   ;;  %461 = vset.pattern.permute.xlu1 (!%p159_p3), %v489_v4  ;;  %v278_v13 = vsub.s32 (!%p159_p3), 2, %v225_v7  ;;  %v282_v14 = vsub.s32 (!%p159_p3), 6, %v225_v7  ;;  %v304_v21 = vsub.s32 (!%p159_p3), 3, %v225_v7  ;;  %v308_v22 = vsub.s32 (!%p159_p3), 7, %v225_v7 }
   0xd   : > { %273 = vperm.xlu1 (!%p159_p3), %461, %v211_v0  }
   0xe   : > { %s566_s12 = smov (!%p191_p4, %s477_s12), 1 }
   0xf   : > { %s429_s20 = sshll.u32 %s566_s12, 3 }
  0x10   : > { %462 = vset.pattern.permute.xlu0 %v490_v5  ;;  %s198_s23 = scalar_lea.vmem %s557_s0, %s429_s20  ;;  %s208_s26 = scalar_lea.vmem %s560_s3, %s429_s20 }
  0x11   : > { %299 = vperm.xlu0 %462, %v211_v0   ;;  %v210_v10 = vld [vmem:[%s198_s23] sm:$0xff] }
  0x12   : > { %v227_v15 = vrot.slane %v210_v10, %v226_v8  ;;  %v231_v16 = vrot.slane %v210_v10, %v230_v9  ;;  %v253_v17 = vrot.slane %v210_v10, %v252_v11  ;;  %v257_v18 = vrot.slane %v210_v10, %v256_v12 }
  0x13   : > { %v279_v19 = vrot.slane %v210_v10, %v278_v13  ;;  %v283_v20 = vrot.slane %v210_v10, %v282_v14  ;;  %v305_v31 = vrot.slane %v210_v10, %v304_v21  ;;  %v309_v32 = vrot.slane %v210_v10, %v308_v22 }
  0x14   : > { %v237_v23 = vrot.slane %v227_v15, %v226_v8  ;;  %v241_v24 = vrot.slane %v231_v16, %v226_v8  ;;  %v263_v27 = vrot.slane %v253_v17, %v252_v11  ;;  %v267_v28 = vrot.slane %v257_v18, %v252_v11 }
  0x15   : > { %v289_v29 = vrot.slane %v279_v19, %v278_v13  ;;  %v293_v30 = vrot.slane %v283_v20, %v278_v13  ;;  %v315_v43 = vrot.slane %v305_v31, %v304_v21  ;;  %v319_v44 = vrot.slane %v309_v32, %v304_v21 }
  0x87   : > { %v221_v25 = vpop.permute.xlu0 %220  ;;  %v248_v26 = vpop.permute.xlu1 %247 }
  0x88   : > { %v242_v33 = vmul.f32 %v237_v23, %v221_v25  ;;  %v243_v34 = vmul.f32 %v241_v24, %v221_v25  ;;  %v268_v36 = vmul.f32 %v263_v27, %v248_v26  ;;  %v269_v37 = vmul.f32 %v267_v28, %v248_v26 }
  0x8b   : > { %v216_v35 = vpop.permute.xlu0 %215 }
  0x8c   : > { %v244_v38 = vadd.f32 %v242_v33, %v216_v35  ;;  %v245_v39 = vadd.f32 %v243_v34, %v216_v35  ;;  %v274_v40 = vpop.permute.xlu1 %273 }
  0x8d   : > { %v294_v41 = vmul.f32 %v289_v29, %v274_v40  ;;  %v295_v42 = vmul.f32 %v293_v30, %v274_v40 }
  0x8e   : > { %v270_v45 = vadd.f32 %v268_v36, %v244_v38  ;;  %v271_v46 = vadd.f32 %v269_v37, %v245_v39 }
  0x90   : > { %v296_v47 = vadd.f32 %v294_v41, %v270_v45  ;;  %v297_v48 = vadd.f32 %v295_v42, %v271_v46  ;;  %v300_v49 = vpop.permute.xlu0 %299 }
  0x91   : > { %v320_v50 = vmul.f32 %v315_v43, %v300_v49  ;;  %v321_v51 = vmul.f32 %v319_v44, %v300_v49 }
  0x93   : > { %v322_v52 = vadd.f32 %v320_v50, %v296_v47  ;;  %v323_v53 = vadd.f32 %v321_v51, %v297_v48 }
  0x95   : > { %v324_v54 = vmax.f32 %v322_v52, 0.0  ;;  %v325_v55 = vmax.f32 %v323_v53, 0.0 }
  0x97   : > { %v328_v56 = vcombine.low %v324_v54, %v325_v55 }
  0x99   : > { %330 = vst [vmem:[%s208_s26] sm:$0xff] %v328_v56 }
  0x9a PF: > { %s13_s14 = sadd.s32 1, %s485_s14   ;;  %s561_s12 = smov %s481_s13 }
  0x9b   : > { %p10_p5 = scmp.ge.s32.totalorder %s13_s14, 4   ;;  %s562_s13 = smov %s564_s15 }
  0x9d   :  { %12 = sbr.rel (!%p10_p5) target bundleno = 2 (0x2), region = 62 }

</bundles_post_ra>
